<compile_context>
chip_gen: v6e
topology: v6e:2x2x1
jax: 0.10.0
libtpu: 0.0.40
codegen_flags: <defaults>
</compile_context>

<pallas_src>
import functools

import jax
import jax.numpy as jnp
from jax.experimental import pallas as pl
from jax.experimental.pallas import tpu as pltpu


def _round_up(x, m):
    return ((x + m - 1) // m) * m


def _ae_kernel(x_ref, w1_ref, b1_ref, w2_ref, b2_ref, o_ref):
    """One batch tile.

    x_ref : (TB, 784) f32/bf16
    w1_ref: (784, H)  bfloat16
    b1_ref: (1, H)    float32
    w2_ref: (H, 784)  bfloat16
    b2_ref: (1, 784)  float32
    o_ref : (TB, 784) out_dtype
    """
    x = x_ref[...].astype(jnp.bfloat16)

    # fc4 + ReLU (MXU bf16 operands, f32 accumulation; bias/ReLU in f32 on the VPU).
    h = jnp.dot(x, w1_ref[...], preferred_element_type=jnp.float32) + b1_ref[...]
    h = jnp.maximum(h, 0.0)

    # fc5 + sigmoid. exp and the approx reciprocal both use the EUP slot, which is free
    # under the DMA. exp(-y) -> inf for very negative y gives 1/inf -> 0 (correct limit,
    # no NaN), so no extra select-based stabilization is needed.
    y = jnp.dot(h.astype(jnp.bfloat16), w2_ref[...],
                preferred_element_type=jnp.float32) + b2_ref[...]
    sig = pl.reciprocal(1.0 + jnp.exp(-y), approx=True)

    o_ref[...] = sig.astype(o_ref.dtype)


@functools.partial(jax.jit, static_argnames=("tile_b", "out_dtype"))
def ae_forward(x, w1, b1, w2, b2, *, tile_b=2048, out_dtype=jnp.float32):
    """x: (..., 28, 28) (or anything reshapable to (-1, 784)) -> (B, 28, 28)."""
    x_flat = x.reshape(-1, 784)
    B = x_flat.shape[0]
    H = w1.shape[1]

    # Sublane-align the requested tile: a tiled (TB, 784) BlockSpec needs TB % 8 == 0.
    tile_b = max(8, (int(tile_b) // 8) * 8)

    if B <= 16:
        # Tiny batch: one full-extent block (block == array dims, so no (8,128)
        # constraint and no padding/slicing needed).
        TB = B
    else:
        # Aim for >= 2 tiles so the "parallel" batch axis feeds both TensorCores on
        # v7x, capped at tile_b. The ragged last tile (if B % TB != 0) is masked by
        # Pallas: OOB output rows are simply not written — no pad/slice HBM passes.
        TB = min(tile_b, _round_up(pl.cdiv(B, 2), 8))
    grid_b = pl.cdiv(B, TB)

    # bf16 matmul operands (no-op if the caller already stores bf16 weights).
    w1b = w1.astype(jnp.bfloat16)
    w2b = w2.astype(jnp.bfloat16)

    out_itemsize = jnp.dtype(out_dtype).itemsize
    cost = pl.CostEstimate(
        flops=4 * B * 784 * H,                                   # two matmuls
        transcendentals=B * 784,                                 # sigmoid exp
        bytes_accessed=(B * 784 * (x_flat.dtype.itemsize + out_itemsize)
                        + (w1b.size + w2b.size) * 2              # bf16 weights
                        + (b1.size + b2.size) * 4),              # f32 biases
    )

    out_flat = pl.pallas_call(
        _ae_kernel,
        out_shape=jax.ShapeDtypeStruct((B, 784), out_dtype),
        grid=(grid_b,),
        in_specs=[
            pl.BlockSpec((TB, 784), lambda i: (i, 0)),    # x tile: walks the batch
            pl.BlockSpec(w1b.shape, lambda i: (0, 0)),    # weights stay VMEM-resident
            pl.BlockSpec(b1.shape, lambda i: (0, 0)),
            pl.BlockSpec(w2b.shape, lambda i: (0, 0)),
            pl.BlockSpec(b2.shape, lambda i: (0, 0)),
        ],
        out_specs=pl.BlockSpec((TB, 784), lambda i: (i, 0)),
        compiler_params=pltpu.CompilerParams(
            dimension_semantics=("parallel",),            # independent batch tiles
            # TB=2048 double-buffered (f32 in + f32 out) ~= 30 MiB; 48 MiB leaves
            # headroom for Mosaic internals and fits v7x's 64 MiB physical VMEM.
            vmem_limit_bytes=48 * 1024 * 1024,
        ),
        cost_estimate=cost,
    )(x_flat, w1b, b1, w2b, b2)

    return out_flat.reshape(-1, 28, 28)


def init_params(key, hidden_dim):
    """Matches nn.Linear default init U(-1/sqrt(fan_in), +1/sqrt(fan_in)).

    Weights are stored as (in_features, out_features), so the kernel's x @ W is
    equivalent to PyTorch's x @ W.T with its (out, in) layout.
    """
    k1, k2, k3, k4 = jax.random.split(key, 4)
    bound1 = 1.0 / jnp.sqrt(784.0)
    bound2 = 1.0 / jnp.sqrt(float(hidden_dim))
    w1 = jax.random.uniform(k1, (784, hidden_dim), jnp.float32, -bound1, bound1)
    b1 = jax.random.uniform(k2, (1, hidden_dim), jnp.float32, -bound1, bound1)
    w2 = jax.random.uniform(k3, (hidden_dim, 784), jnp.float32, -bound2, bound2)
    b2 = jax.random.uniform(k4, (1, 784), jnp.float32, -bound2, bound2)
    return w1, b1, w2, b2


def _reference(x, w1, b1, w2, b2):
    x_flat = x.reshape(-1, 784)
    h = jnp.maximum(x_flat @ w1 + b1, 0.0)
    return jax.nn.sigmoid(h @ w2 + b2).reshape(-1, 28, 28)


if __name__ == "__main__":
    hidden_dim = 32

    key = jax.random.PRNGKey(0)
    k_x1, k_x2, k_p = jax.random.split(key, 3)

    w1, b1, w2, b2 = init_params(k_p, hidden_dim)
    # Pre-cast weights to bf16 once (outside jit); the in-wrapper astype is then a no-op.
    w1b = w1.astype(jnp.bfloat16)
    w2b = w2.astype(jnp.bfloat16)

    # Case 1: tiny batch (single full-extent block path).
    batch = 2
    x = jax.random.uniform(k_x1, (batch, 28, 28), jnp.float32)
    out = jax.block_until_ready(ae_forward(x, w1b, b1, w2b, b2))
    y_ref = _reference(x, w1, b1, w2, b2)
    assert out.shape == (batch, 28, 28)
    assert bool(jnp.all(jnp.isfinite(out)))
    assert jnp.allclose(out, y_ref, atol=2e-2), "mismatch vs reference (small batch)"

    # Case 2: multi-tile path with a ragged last tile (exercises masked tail writes).
    batch2 = 40
    x2 = jax.random.uniform(k_x2, (batch2, 28, 28), jnp.float32)
    out2 = jax.block_until_ready(ae_forward(x2, w1b, b1, w2b, b2, tile_b=16))
    y_ref2 = _reference(x2, w1, b1, w2, b2)
    assert out2.shape == (batch2, 28, 28)
    assert bool(jnp.all(jnp.isfinite(out2)))
    assert jnp.allclose(out2, y_ref2, atol=2e-2), "mismatch vs reference (tiled batch)"

    print("KERNEL_OK")
</pallas_src>

<mosaic_0001>
module attributes {stable_mosaic.version = 11 : i64} {
  func.func @_ae_kernel(%arg0: i32, %arg1: memref<2x784xf32, #tpu.memory_space<vmem>>, %arg2: memref<784x32xbf16, #tpu.memory_space<vmem>>, %arg3: memref<1x32xf32, #tpu.memory_space<vmem>>, %arg4: memref<32x784xbf16, #tpu.memory_space<vmem>>, %arg5: memref<1x784xf32, #tpu.memory_space<vmem>>, %arg6: memref<2x784xf32, #tpu.memory_space<vmem>>) attributes {dimension_semantics = [#tpu.dimension_semantics<parallel>], iteration_bounds = array<i64: 1>, scalar_prefetch = 0 : i64, scratch_operands = 0 : i64, tpu.core_type = #tpu.core_type<tc>, window_params = [{transform_indices = @transform_0, window_bounds = array<i64: 2, 784>}, {pipeline_mode = #tpu.pipeline_mode<synchronous>, transform_indices = @transform_1, window_bounds = array<i64: 784, 32>}, {pipeline_mode = #tpu.pipeline_mode<synchronous>, transform_indices = @transform_2, window_bounds = array<i64: 1, 32>}, {pipeline_mode = #tpu.pipeline_mode<synchronous>, transform_indices = @transform_3, window_bounds = array<i64: 32, 784>}, {pipeline_mode = #tpu.pipeline_mode<synchronous>, transform_indices = @transform_4, window_bounds = array<i64: 1, 784>}, {transform_indices = @transform_5, window_bounds = array<i64: 2, 784>}]} {
    %c0 = arith.constant 0 : index
    %c0_0 = arith.constant 0 : index
    %0 = vector.load %arg1[%c0, %c0_0] : memref<2x784xf32, #tpu.memory_space<vmem>>, vector<2x784xf32>
    %1 = arith.truncf %0 : vector<2x784xf32> to vector<2x784xbf16>
    %c0_1 = arith.constant 0 : index
    %c0_2 = arith.constant 0 : index
    %2 = vector.load %arg2[%c0_1, %c0_2] : memref<784x32xbf16, #tpu.memory_space<vmem>>, vector<784x32xbf16>
    %cst = arith.constant dense<0.000000e+00> : vector<2x32xf32>
    %3 = tpu.matmul %1, %2, %cst {dimension_numbers = #tpu.dot_dimension_numbers<[1], [0], [0], [1], [0, 0, 1, 1], [], []>} : vector<2x784xbf16>, vector<784x32xbf16>, vector<2x32xf32> -> vector<2x32xf32>
    %c0_3 = arith.constant 0 : index
    %c0_4 = arith.constant 0 : index
    %4 = vector.load %arg3[%c0_3, %c0_4] : memref<1x32xf32, #tpu.memory_space<vmem>>, vector<1x32xf32>
    %5 = vector.broadcast %4 : vector<1x32xf32> to vector<2x32xf32>
    %6 = arith.addf %3, %5 : vector<2x32xf32>
    %cst_5 = arith.constant 0.000000e+00 : f32
    %7 = vector.broadcast %cst_5 : f32 to vector<2x32xf32>
    %8 = arith.maximumf %6, %7 : vector<2x32xf32>
    %9 = arith.truncf %8 : vector<2x32xf32> to vector<2x32xbf16>
    %c0_6 = arith.constant 0 : index
    %c0_7 = arith.constant 0 : index
    %10 = vector.load %arg4[%c0_6, %c0_7] : memref<32x784xbf16, #tpu.memory_space<vmem>>, vector<32x784xbf16>
    %cst_8 = arith.constant dense<0.000000e+00> : vector<2x784xf32>
    %11 = tpu.matmul %9, %10, %cst_8 {dimension_numbers = #tpu.dot_dimension_numbers<[1], [0], [0], [1], [0, 0, 1, 1], [], []>} : vector<2x32xbf16>, vector<32x784xbf16>, vector<2x784xf32> -> vector<2x784xf32>
    %c0_9 = arith.constant 0 : index
    %c0_10 = arith.constant 0 : index
    %12 = vector.load %arg5[%c0_9, %c0_10] : memref<1x784xf32, #tpu.memory_space<vmem>>, vector<1x784xf32>
    %13 = vector.broadcast %12 : vector<1x784xf32> to vector<2x784xf32>
    %14 = arith.addf %11, %13 : vector<2x784xf32>
    %cst_11 = arith.constant 0.000000e+00 : f32
    %15 = vector.broadcast %cst_11 : f32 to vector<2x784xf32>
    %16 = arith.subf %15, %14 : vector<2x784xf32>
    %17 = math.exp %16 : vector<2x784xf32>
    %cst_12 = arith.constant 1.000000e+00 : f32
    %18 = vector.broadcast %cst_12 : f32 to vector<2x784xf32>
    %19 = arith.addf %18, %17 : vector<2x784xf32>
    %20 = tpu.reciprocal %19 {approx = true} : vector<2x784xf32> -> vector<2x784xf32>
    %c0_13 = arith.constant 0 : index
    %c0_14 = arith.constant 0 : index
    %21 = vector.load %arg6[%c0_13, %c0_14] : memref<2x784xf32, #tpu.memory_space<vmem>>, vector<2x784xf32>
    tpu.vector_store %arg6[%c0_13, %c0_14], %20 {strides = array<i32>} : memref<2x784xf32, #tpu.memory_space<vmem>>, vector<2x784xf32>,
    return
  }
  func.func @transform_0(%arg0: i32) -> (i32, i32) {
    %c0_i32 = arith.constant 0 : i32
    %c0_i32_0 = arith.constant 0 : i32
    return %arg0, %c0_i32 : i32, i32
  }
  func.func @transform_1(%arg0: i32) -> (i32, i32) {
    %c0_i32 = arith.constant 0 : i32
    %c0_i32_0 = arith.constant 0 : i32
    %c0_i32_1 = arith.constant 0 : i32
    return %c0_i32, %c0_i32_0 : i32, i32
  }
  func.func @transform_2(%arg0: i32) -> (i32, i32) {
    %c0_i32 = arith.constant 0 : i32
    %c0_i32_0 = arith.constant 0 : i32
    %c0_i32_1 = arith.constant 0 : i32
    return %c0_i32, %c0_i32_0 : i32, i32
  }
  func.func @transform_3(%arg0: i32) -> (i32, i32) {
    %c0_i32 = arith.constant 0 : i32
    %c0_i32_0 = arith.constant 0 : i32
    %c0_i32_1 = arith.constant 0 : i32
    return %c0_i32, %c0_i32_0 : i32, i32
  }
  func.func @transform_4(%arg0: i32) -> (i32, i32) {
    %c0_i32 = arith.constant 0 : i32
    %c0_i32_0 = arith.constant 0 : i32
    %c0_i32_1 = arith.constant 0 : i32
    return %c0_i32, %c0_i32_0 : i32, i32
  }
  func.func @transform_5(%arg0: i32) -> (i32, i32) {
    %c0_i32 = arith.constant 0 : i32
    %c0_i32_0 = arith.constant 0 : i32
    return %arg0, %c0_i32 : i32, i32
  }
}

</mosaic_0001>

<bundles_post_ra>
// kernel: ae_forward.1
= control target key start
LH: loop header
LB: loop body
LE: loop exit
PB: predicated region body
PF: predicated region fallthrough
CT: control target
= control target key end

     0   :  { %v1274_v21 = vmov 1983009808   ;;  %v29_v23 = vlaneseq  ;;  %v1275_v47 = vmov 0.0   ;;  %vm1276_vm0 = vmmov 0   ;;  %s1546_s1 = inlined_call_operand.vmem [shape: bf16[784,32], index: 1, kind: input, shape index: {}]   ;;  %s1547_s0 = inlined_call_operand.vmem [shape: f32[2,784], index: 0, kind: input, shape index: {}]   ;;  %s1548_s3 = inlined_call_operand.vmem [shape: bf16[32,784], index: 3, kind: input, shape index: {}]   ;;  %s1549_s2 = inlined_call_operand.vmem [shape: f32[1,32], index: 2, kind: input, shape index: {}]   ;;  %s1550_s4 = inlined_call_operand.vmem [shape: f32[1,784], index: 4, kind: input, shape index: {}]   ;;  %s1551_s5 = inlined_call_operand.vmem [shape: f32[2,784], index: 5, kind: output, shape index: {}]  }
   0x1   :  { %v1175_v0 = vld [vmem:[%s1546_s1 + $0x78] sm:$0xff]   ;;  %v1179_v4 = vld [vmem:[%s1546_s1 + $0x70] sm:$0xff]   ;;  %v1183_v8 = vld [vmem:[%s1546_s1 + $0x68] sm:$0xff]   ;;  %v27_v22 = vunpack.c.l.s4 %v1274_v21  ;;  %vm471_vm1 = vcmask 130048   ;;  %vm762_vm2 = vcmask 261120   ;;  %vm1007_vm3 = vcmask 1041408  }
   0x2   :  { %v1176_v1 = vld [vmem:[%s1546_s1 + $0x38] sm:$0xff]   ;;  %1086 = vmatprep.subr.bf16.mxu0 %v1175_v0  ;;  %v1180_v5 = vld [vmem:[%s1546_s1 + $0x30] sm:$0xff]   ;;  %v1184_v9 = vld [vmem:[%s1546_s1 + $0x28] sm:$0xff]   ;;  %v1383_v29 = vshrl.u32 %v29_v23, 7  ;;  %vm1008_vm4 = vcmask 1043458   ;;  %vm1010_vm6 = vcmask 128004  }
   0x3   :  { %v1177_v2 = vld [vmem:[%s1546_s1 + $0xf8] sm:$0xff]   ;;  %1087 = vmatpush3.bf16.msra.mxu0 %v1176_v1  ;;  %v1181_v6 = vld [vmem:[%s1546_s1 + $0xf0] sm:$0xff]   ;;  %v1185_v10 = vld [vmem:[%s1546_s1 + $0xe8] sm:$0xff]   ;;  %v28_v28 = vunpack.c.0.s8 %v27_v22 }
   0x4   :  { %v1178_v3 = vld [vmem:[%s1546_s1 + $0xb8] sm:$0xff]   ;;  %1108 = vmatprep.subr.bf16.mxu1 %v1177_v2  ;;  %1088 = vmatprep.subr.bf16.mxu0 %v1179_v4  ;;  %v1182_v7 = vld [vmem:[%s1546_s1 + $0xb0] sm:$0xff]   ;;  %v1186_v11 = vld [vmem:[%s1546_s1 + $0xa8] sm:$0xff]  }
   0x5   :  { %1109 = vmatpush3.bf16.msra.mxu1 %v1178_v3  ;;  %v1187_v12 = vld [vmem:[%s1546_s1 + $0x60] sm:$0xff]   ;;  %v1191_v16 = vld [vmem:[%s1546_s1 + $0x58] sm:$0xff]   ;;  %v1195_v20 = vld [vmem:[%s1546_s1 + $0x50] sm:$0xff]   ;;  %v1398_v34 = vsub.s32 %v28_v28, %v1383_v29 }
   0x6   :  { %1110 = vmatprep.subr.bf16.mxu1 %v1181_v6  ;;  %v1188_v13 = vld [vmem:[%s1546_s1 + $0x20] sm:$0xff]   ;;  %v1192_v17 = vld [vmem:[%s1546_s1 + $0x18] sm:$0xff]   ;;  %v1196_v24 = vld [vmem:[%s1546_s1 + $0x10] sm:$0xff]  }
   0x7   :  { %1089 = vmatpush3.bf16.msra.mxu0 %v1180_v5  ;;  %v1189_v14 = vld [vmem:[%s1546_s1 + $0xe0] sm:$0xff]   ;;  %v1193_v18 = vld [vmem:[%s1546_s1 + $0xd8] sm:$0xff]   ;;  %v1197_v25 = vld [vmem:[%s1546_s1 + $0xd0] sm:$0xff]  }
   0x8   :  { %1090 = vmatprep.subr.bf16.mxu0 %v1183_v8  ;;  %v1190_v15 = vld [vmem:[%s1546_s1 + $0xa0] sm:$0xff]   ;;  %v1194_v19 = vld [vmem:[%s1546_s1 + $0x98] sm:$0xff]   ;;  %v1198_v26 = vld [vmem:[%s1546_s1 + $0x90] sm:$0xff]  }
   0x9   :  { %1111 = vmatpush3.bf16.msra.mxu1 %v1182_v7  ;;  %v1199_v27 = vld [vmem:[%s1546_s1 + $0x48] sm:$0xff]   ;;  %v1203_v33 = vld [vmem:[%s1546_s1 + $0x40] sm:$0xff]   ;;  %v1208_v43 = vld [vmem:[%s1546_s1 + $0x178] sm:$0xff]  }
   0xa   :  { %1112 = vmatprep.subr.bf16.mxu1 %v1185_v10  ;;  %v1200_v30 = vld [vmem:[%s1546_s1 + $0x8] sm:$0xff]   ;;  %v1204_v35 = vld [vmem:[%s1546_s1] sm:$0xff]   ;;  %v1210_v51 = vld [vmem:[%s1546_s1 + $0x138] sm:$0xff]  }
   0xb   :  { %1091 = vmatpush3.bf16.msra.mxu0 %v1184_v9  ;;  %v1201_v31 = vld [vmem:[%s1546_s1 + $0xc8] sm:$0xff]   ;;  %v1205_v36 = vld [vmem:[%s1546_s1 + $0xc0] sm:$0xff]   ;;  %v1211_v53 = vld [vmem:[%s1546_s1 + $0x170] sm:$0xff]  }
   0xc   :  { %1092 = vmatprep.subr.bf16.mxu0 %v1187_v12  ;;  %v1202_v32 = vld [vmem:[%s1546_s1 + $0x88] sm:$0xff]   ;;  %v21_v37 = vld [vmem:[%s1547_s0] sm:$0xff]  ;;  %v1212_v56 = vld [vmem:[%s1546_s1 + $0x130] sm:$0xff]  }
   0xd   :  { %1113 = vmatpush3.bf16.msra.mxu1 %v1186_v11  ;;  %v22_v38 = vld [vmem:[%s1547_s0 + $0x8] sm:$0x3f]  ;;  %v32_v39 = vrot.slane %v21_v37, %v1398_v34  ;;  %v1207_v40 = vld [vmem:[%s1546_s1 + $0x80] sm:$0xff]   ;;  %v25_v41 = vcombine.high %v21_v37, %v21_v37  ;;  %v1217_v63 = vld [vmem:[%s1546_s1 + $0x158] sm:$0xff]  }
   0xe   :  { %1114 = vmatprep.subr.bf16.mxu1 %v1189_v14  ;;  %v49_v42 = vrot.slane %v22_v38, %v1398_v34  ;;  %v1213_v57 = vld [vmem:[%s1546_s1 + $0x168] sm:$0xff]   ;;  %v42_v58 = vcombine.high %v22_v38, %v22_v38  ;;  %v1215_v60 = vld [vmem:[%s1546_s1 + $0x160] sm:$0xff]   ;;  %v1218_v2 = vld [vmem:[%s1546_s1 + $0x118] sm:$0xff]  }
   0xf   :  { %1093 = vmatpush3.bf16.msra.mxu0 %v1188_v13  ;;  %v40_v44 = vcombine.high %v32_v39, %v32_v39  ;;  %v39_v45 = vrot.slane %v25_v41, %v1398_v34  ;;  %v65_v46 = vpack.c.bf16 %v32_v39, %v32_v39  ;;  %v1214_v59 = vld [vmem:[%s1546_s1 + $0x128] sm:$0xff]   ;;  %v1216_v62 = vld [vmem:[%s1546_s1 + $0x120] sm:$0xff]   ;;  %v1219_v3 = vld [vmem:[%s1546_s1 + $0x150] sm:$0xff]  }
  0x10   :  { %1094 = vmatprep.subr.bf16.mxu0 %v1191_v16  ;;  %v57_v48 = vcombine.high %v49_v42, %v49_v42  ;;  %v56_v61 = vrot.slane %v42_v58, %v1398_v34  ;;  %v1225_v0 = vld [vmem:[%s1546_s1 + $0x180] sm:$0xff]   ;;  %v1220_v4 = vld [vmem:[%s1546_s1 + $0x110] sm:$0xff]   ;;  %v1221_v5 = vld [vmem:[%s1546_s1 + $0x148] sm:$0xff]   ;;  %v69_v9 = vpack.c.bf16 %v49_v42, %v49_v42 }
  0x11   :  { %1115 = vmatpush3.bf16.msra.mxu1 %v1190_v15  ;;  %v66_v49 = vpack.c.bf16 %v40_v44, %v40_v44  ;;  %v41_v50 = vcombine.high %v39_v45, %v39_v45  ;;  %v67_v52 = vpack.c.bf16 %v39_v45, %v39_v45  ;;  %v1222_v6 = vld [vmem:[%s1546_s1 + $0x108] sm:$0xff]   ;;  %v1223_v7 = vld [vmem:[%s1546_s1 + $0x140] sm:$0xff]   ;;  %v1228_v10 = vld [vmem:[%s1548_s3 + $0x3c] ss:$28 sps:$4 sm:$0xff]  }
  0x12   :  { %1116 = vmatprep.subr.bf16.mxu1 %v1193_v18  ;;  %v70_v55 = vpack.c.bf16 %v57_v48, %v57_v48  ;;  %v71_v1 = vpack.c.bf16 %v56_v61, %v56_v61  ;;  %v1224_v8 = vld [vmem:[%s1546_s1 + $0x100] sm:$0xff]   ;;  %v1226_v11 = vld [vmem:[%s1548_s3 + $0x38] ss:$28 sps:$4 sm:$0xff]   ;;  %v1229_v12 = vld [vmem:[%s1548_s3 + $0x50] ss:$28 sps:$4 sm:$0xff]   ;;  %v681_v61 = vsub.s32 6, %v1383_v29 }
  0x13   :  { %1095 = vmatpush3.bf16.msra.mxu0 %v1192_v17  ;;  %507 = vmatprep.mubr.bf16.mxu0 %v66_v49  ;;  %v68_v54 = vpack.c.bf16 %v41_v50, %v41_v50  ;;  %v1232_v13 = vld [vmem:[%s1548_s3 + $0x4] ss:$28 sps:$4 sm:$0xff]   ;;  %v1233_v15 = vld [vmem:[%s1548_s3 + $0x18] ss:$28 sps:$4 sm:$0xff]   ;;  %v1277_v17 = vmov 0   ;;  %vm1009_vm5 = vmor %vm1008_vm4, %vm1007_vm3 }
  0x14   :  { %1096 = vmatprep.subr.bf16.mxu0 %v1195_v20  ;;  %v1230_v14 = vld [vmem:[%s1548_s3] ss:$28 sps:$4 sm:$0xff]   ;;  %v1237_v48 = vld [vmem:[%s1548_s3 + $0x8] ss:$28 sps:$4 sm:$0xff]   ;;  %vm1011_vm7 = vmor %vm1010_vm6, %vm1009_vm5 }
  0x15   :  { %1117 = vmatpush3.bf16.msra.mxu1 %v1194_v19  ;;  %547 = vmatprep.mubr.bf16.mxu1 %v68_v54  ;;  %v1236_v16 = vld [vmem:[%s1548_s3 + $0x44] ss:$28 sps:$4 sm:$0xff]   ;;  %v1242_v49 = vld [vmem:[%s1548_s3 + $0x4c] ss:$28 sps:$4 sm:$0xff]  }
  0x16   :  { %1118 = vmatprep.subr.bf16.mxu1 %v1197_v25  ;;  %v1234_v45 = vld [vmem:[%s1548_s3 + $0x40] ss:$28 sps:$4 sm:$0xff]   ;;  %v1240_v50 = vld [vmem:[%s1548_s3 + $0x48] ss:$28 sps:$4 sm:$0xff]  }
  0x17   :  { %1097 = vmatpush3.bf16.msra.mxu0 %v1196_v24  ;;  %v653_v54 = vld [vmem:[%s1550_s4] sm:$0x7f] }
  0x18   :  { %1098 = vmatprep.subr.bf16.mxu0 %v1199_v27 }
  0x19   :  { %1119 = vmatpush3.bf16.msra.mxu1 %v1198_v26 }
  0x1a   :  { %1120 = vmatprep.subr.bf16.mxu1 %v1201_v31 }
  0x1b   :  { %1099 = vmatpush3.bf16.msra.mxu0 %v1200_v30 }
  0x1c   :  { %1100 = vmatprep.subr.bf16.mxu0 %v1203_v33 }
  0x1d   :  { %1121 = vmatpush3.bf16.msra.mxu1 %v1202_v32  ;;  %v1017_v32 = vld [vmem:[%s1549_s2] ss:$0 sm:$0xff] }
  0x1e   :  { %1122 = vmatprep.subr.bf16.mxu1 %v1205_v36 }
  0x1f   :  { %1101 = vmatpush3.bf16.msra.mxu0 %v1204_v35 }
  0x20   :  { %1130 = vmatprep.subr.bf16.mxu0 %v1208_v43 }
  0x21   :  { %1123 = vmatpush3.bf16.msra.mxu1 %v1207_v40 }
  0x22   :  { %1157 = vmatprep.subr.bf16.mxu1 %v1275_v47  ;;  %508 = vmatmul.mubr.bf16.vlgmr.msra.gmra.mxu0 %v65_v46 }
  0x23   :  { %1131 = vmatpush3.bf16.msra.mxu0 %v1210_v51  ;;  %587 = vmatprep.mubr.bf16.mxu0 %v70_v55  ;;  %v1245_v51 = vld [vmem:[%s1548_s3 + $0x14] ss:$28 sps:$4 sm:$0xff]   ;;  %v661_v55 = vsub.s32 1, %v1383_v29 }
  0x24   :  { %548 = vmatmul.mubr.bf16.vlgmr.msra.gmra.mxu1 %v67_v52  ;;  %1132 = vmatprep.subr.bf16.mxu0 %v1211_v53  ;;  %v1243_v52 = vld [vmem:[%s1548_s3 + $0x10] ss:$28 sps:$4 sm:$0xff]   ;;  %v657_v53 = vsub.s32 0, %v1383_v29 }
  0x25   :  { %1159 = vmatprep.mubr.msk.bf16.mxu1 %vm1276_vm0, %v1275_v47  ;;  %1158 = vmatpush3.bf16.msra.mxu1 %v1225_v0 }
  0x26   :  { %778 = vmatprep.subr.bf16.mxu1 %v1228_v10 }
  0x27   :  { %1133 = vmatpush3.bf16.msra.mxu0 %v1212_v56  ;;  %v658_v56 = vrot.slane %v653_v54, %v657_v53 }
  0x28   :  { %1134 = vmatprep.subr.bf16.mxu0 %v1213_v57  ;;  %v662_v57 = vrot.slane %v653_v54, %v661_v55 }
  0x2b   :  { %1135 = vmatpush3.bf16.msra.mxu0 %v1214_v59 }
  0x2c   :  { %1136 = vmatprep.subr.bf16.mxu0 %v1215_v60  ;;  %1160 = vmatmul.mubr.msk.bf16.vlgmr.msra.gmra.mxu1 %vm471_vm1, %v71_v1 }
  0x2d   :  { %779 = vmatpush1.bf16.msra.mxu1 %v1226_v11  ;;  %798 = vmatprep.mubr.bf16.mxu1 %v1277_v17 }
  0x2e   :  { %780 = vmatprep.subr.bf16.mxu1 %v1232_v13 }
  0x2f   :  { %1137 = vmatpush3.bf16.msra.mxu0 %v1216_v62  ;;  %v665_v62 = vsub.s32 2, %v1383_v29 }
  0x30   :  { %1138 = vmatprep.subr.bf16.mxu0 %v1217_v63 }
  0x31   :  { %781 = vmatpush1.bf16.msra.mxu1 %v1230_v14 }
  0x32   :  { %819 = vmatprep.subr.bf16.mxu1 %v1236_v16 }
  0x33   :  { %1139 = vmatpush3.bf16.msra.mxu0 %v1218_v2 }
  0x34   :  { %1140 = vmatprep.subr.bf16.mxu0 %v1219_v3  ;;  %v669_v3 = vsub.s32 3, %v1383_v29 }
  0x36   :  { %v670_v13 = vrot.slane %v653_v54, %v669_v3 }
  0x37   :  { %1141 = vmatpush3.bf16.msra.mxu0 %v1220_v4 }
  0x38   :  { %1142 = vmatprep.subr.bf16.mxu0 %v1221_v5 }
  0x3b   :  { %1143 = vmatpush3.bf16.msra.mxu0 %v1222_v6  ;;  %v682_v6 = vrot.slane %v653_v54, %v681_v61 }
  0x3c   :  { %1144 = vmatprep.subr.bf16.mxu0 %v1223_v7 }
  0x3f   :  { %1145 = vmatpush3.bf16.msra.mxu0 %v1224_v8  ;;  %v666_v8 = vrot.slane %v653_v54, %v665_v62 }
  0x40   :  { %1163 = vmatprep.subr.bf16.mxu0 %v1275_v47 }
  0x42   :  { %588 = vmatmul.mubr.bf16.vlgmr.msra.gmra.mxu0 %v69_v9 }
  0x43   :  { %1167 = vmatprep.mubr.msk.bf16.mxu0 %vm1276_vm0, %v1275_v47  ;;  %1164 = vmatpush3.bf16.msra.mxu0 %v1229_v12 }
  0x44   :  { %1165 = vmatprep.subr.bf16.mxu0 %v1275_v47  ;;  %v1239_v47 = vld [vmem:[%s1548_s3 + $0xc] ss:$28 sps:$4 sm:$0xff]  }
  0x47   :  { %1166 = vmatpush3.bf16.msra.mxu0 %v1233_v15 }
  0xe2   :  { %v1102_v18 = vpop.f32.mrf.mxu0 }
  0xe4   :  { %v1103_v19 = vpop.f32.mrf.mxu0  ;;  %v1124_v20 = vpop.f32.mrf.mxu1 }
  0xe5   :  { %v1104_v31 = vadd.f32 %v1103_v19, %v1102_v18 }
  0xe6   :  { %v1105_v21 = vpop.f32.mrf.mxu0  ;;  %v1125_v22 = vpop.f32.mrf.mxu1 }
  0xe7   :  { %v510_v33 = vadd.f32 %v1104_v31, %v1017_v32  ;;  %v1126_v35 = vadd.f32 %v1125_v22, %v1124_v20  ;;  %v677_v21 = vsub.s32 5, %v1383_v29 }
  0xe8   :  { %v1106_v23 = vpop.f32.mrf.mxu0  ;;  %v1127_v24 = vpop.f32.mrf.mxu1 }
  0xe9   :  { %v550_v38 = vadd.f32 %v1126_v35, %v510_v33 }
  0xea   :  { %v1128_v25 = vpop.f32.mrf.mxu1 }
  0xec   :  { %v629_v26 = vpop.f32.mrf.mxu1 }
  0xee   :  { %v1161_v27 = vpop.f32.mrf.mxu1 }
  0xf0   :  { %v632_v28 = vpop.f32.mrf.mxu1 }
  0xf2   :  { %v1162_v30 = vpop.f32.mrf.mxu1 }
  0xf3   :  { %v678_v30 = vrot.slane %v653_v54, %v677_v21 }
 0x102   :  { %v1146_v36 = vpop.f32.mrf.mxu0 }
 0x104   :  { %v1147_v37 = vpop.f32.mrf.mxu0 }
 0x105   :  { %v1148_v39 = vadd.f32 %v1147_v37, %v1146_v36 }
 0x106   :  { %v1149_v40 = vpop.f32.mrf.mxu0 }
 0x107   :  { %v590_v41 = vadd.f32 %v1148_v39, %v550_v38 }
 0x108   :  { %v1150_v42 = vpop.f32.mrf.mxu0 }
 0x109   :  { %v630_v43 = vadd.f32 %v629_v26, %v590_v41 }
 0x10b   :  { %v635_v44 = vmax.f32 %v630_v43, 0.0 }
 0x10d   :  { %v636_v46 = vpack.c.bf16 %v635_v44, %v635_v44 }
 0x10f   :  { %1082 = vmatmul.mubr.msk.bf16.vlgmr.msra.gmra.mxu1 %vm762_vm2, %v636_v46  ;;  %1168 = vmatmul.mubr.msk.bf16.vlgmr.msra.gmra.mxu0 %vm762_vm2, %v636_v46 }
 0x110   :  { %820 = vmatpush1.bf16.msra.mxu1 %v1234_v45  ;;  %839 = vmatprep.mubr.bf16.mxu1 %v1277_v17 }
 0x111   :  { %821 = vmatprep.subr.bf16.mxu1 %v1239_v47 }
 0x114   :  { %822 = vmatpush1.bf16.msra.mxu1 %v1237_v48 }
 0x115   :  { %860 = vmatprep.subr.bf16.mxu1 %v1242_v49 }
 0x117   :  { %1083 = vmatmul.mubr.msk.bf16.vlgmr.msra.gmra.mxu1 %vm762_vm2, %v636_v46 }
 0x118   :  { %861 = vmatpush1.bf16.msra.mxu1 %v1240_v50  ;;  %880 = vmatprep.mubr.bf16.mxu1 %v1277_v17  ;;  %v673_v17 = vsub.s32 4, %v1383_v29 }
 0x119   :  { %862 = vmatprep.subr.bf16.mxu1 %v1245_v51 }
 0x11a   :  { %v674_v26 = vrot.slane %v653_v54, %v673_v17 }
 0x11c   :  { %863 = vmatpush1.bf16.msra.mxu1 %v1243_v52 }
 0x11f   :  { %1084 = vmatmul.mubr.msk.bf16.vlgmr.msra.gmra.mxu1 %vm762_vm2, %v636_v46 }
 0x1cf   :  { %v800_v58 = vpop.f32.mrf.mxu1  ;;  %v923_v59 = vpop.f32.mrf.mxu0 }
 0x1d0   :  { %v801_v60 = vadd.f32 %v800_v58, %v658_v56  ;;  %v924_v15 = vadd.f32 %v923_v59, %v682_v6 }
 0x1d1   :  { %v802_v63 = vpop.f32.mrf.mxu1  ;;  %v1169_v0 = vpop.f32.mrf.mxu0 }
 0x1d2   :  { %v929_v1 = vsub.f32 0.0, %v801_v60  ;;  %v803_v2 = vadd.f32 %v802_v63, %v662_v57  ;;  %v935_v23 = vsub.f32 0.0, %v924_v15 }
 0x1d3   :  { %v804_v4 = vpop.f32.mrf.mxu1  ;;  %v926_v5 = vpop.f32.mrf.mxu0 }
 0x1d4   :  { %v930_v7 = vsub.f32 0.0, %v803_v2  ;;  %v936_v11 = vmul.f32 1.442695, %v929_v1  ;;  %v948_v32 = vmul.f32 1.442695, %v935_v23 }
 0x1d5   :  { %v805_v9 = vpop.f32.mrf.mxu1  ;;  %v1170_v10 = vpop.f32.mrf.mxu0 }
 0x1d6   :  { %v938_v12 = vmul.f32 1.442695, %v930_v7 }
 0x1d7   :  { %v841_v14 = vpop.f32.mrf.mxu1 }
 0x1d8   :  { %1246 = vpow2.f32 %v938_v12  ;;  %v842_v16 = vadd.f32 %v841_v14, %v666_v8 }
 0x1d9   :  { %v843_v18 = vpop.f32.mrf.mxu1  ;;  %1248 = vpow2.f32 %v936_v11 }
 0x1da   :  { %v931_v19 = vsub.f32 0.0, %v842_v16  ;;  %v844_v20 = vadd.f32 %v843_v18, %v670_v13 }
 0x1db   :  { %v845_v22 = vpop.f32.mrf.mxu1 }
 0x1dc   :  { %v940_v24 = vmul.f32 1.442695, %v931_v19  ;;  %v932_v25 = vsub.f32 0.0, %v844_v20 }
 0x1dd   :  { %v846_v27 = vpop.f32.mrf.mxu1 }
 0x1de   :  { %1250 = vpow2.f32 %v940_v24  ;;  %v942_v28 = vmul.f32 1.442695, %v932_v25 }
 0x1df   :  { %v882_v31 = vpop.f32.mrf.mxu1 }
 0x1e0   :  { %1252 = vpow2.f32 %v942_v28  ;;  %v883_v33 = vadd.f32 %v882_v31, %v674_v26 }
 0x1e1   :  { %v884_v35 = vpop.f32.mrf.mxu1  ;;  %1254 = vpow2.f32 %v948_v32 }
 0x1e2   :  { %v933_v36 = vsub.f32 0.0, %v883_v33  ;;  %v885_v37 = vadd.f32 %v884_v35, %v678_v30 }
 0x1e3   :  { %v886_v38 = vpop.f32.mrf.mxu1 }
 0x1e4   :  { %v934_v39 = vsub.f32 0.0, %v885_v37  ;;  %v944_v40 = vmul.f32 1.442695, %v933_v36 }
 0x1e5   :  { %v1247_v29 = vpop.eup %1246  ;;  %v887_v41 = vpop.f32.mrf.mxu1 }
 0x1e6   :  { %v946_v42 = vmul.f32 1.442695, %v934_v39  ;;  %v1249_v43 = vpop.eup %1248  ;;  %v951_v44 = vadd.f32 1.0, %v1247_v29  ;;  %1256 = vpow2.f32 %v944_v40 }
 0x1e7   :  { %v950_v45 = vadd.f32 1.0, %v1249_v43 }
 0x1e8   :  { %1258 = vpow2.f32 %v946_v42 }
 0x1e9   :  { %1260 = vrcp.f32 %v951_v44 }
 0x1ea   :  { %1262 = vrcp.f32 %v950_v45 }
 0x1eb   :  { %v1251_v46 = vpop.eup %1250 }
 0x1ec   :  { %v952_v47 = vadd.f32 1.0, %v1251_v46 }
 0x1ed   :  { %v1253_v48 = vpop.eup %1252 }
 0x1ee   :  { %v953_v49 = vadd.f32 1.0, %v1253_v48  ;;  %1264 = vrcp.f32 %v952_v47  ;;  %v1255_v50 = vpop.eup %1254 }
 0x1ef   :  { %v956_v51 = vadd.f32 1.0, %v1255_v50 }
 0x1f0   :  { %1266 = vrcp.f32 %v953_v49 }
 0x1f1   :  { %1268 = vrcp.f32 %v956_v51 }
 0x1f3   :  { %v1257_v52 = vpop.eup %1256 }
 0x1f4   :  { %v954_v54 = vadd.f32 1.0, %v1257_v52 }
 0x1f5   :  { %v1259_v53 = vpop.eup %1258 }
 0x1f6   :  { %v955_v55 = vadd.f32 1.0, %v1259_v53  ;;  %v1261_v56 = vpop.eup %1260  ;;  %1270 = vrcp.f32 %v954_v54 }
 0x1f7   :  { %v1263_v57 = vpop.eup %1262 }
 0x1f8   :  { %1272 = vrcp.f32 %v955_v55  ;;  %v971_v59 = vcombine.low %v1263_v57, %v1261_v56 }
 0x1fa   :  { %v979_v62 = vrot.slane %v971_v59, %v1398_v34 }
 0x1fb   :  { %v1265_v58 = vpop.eup %1264 }
 0x1fd   :  { %v1267_v60 = vpop.eup %1266 }
 0x1fe   :  { %v972_v61 = vcombine.low %v1265_v58, %v1267_v60  ;;  %v1269_v1 = vpop.eup %1268 }
 0x1ff   :  { %v1002_v5 = vrot.slane %v1269_v1, %v1398_v34 }
 0x200   :  { %v986_v63 = vrot.slane %v972_v61, %v1398_v34 }
 0x202   :  { %v987_v0 = vcombine.low %v979_v62, %v986_v63 }
 0x203   :  { %v1271_v2 = vpop.eup %1270 }
 0x204   :  { %1006 = vst [vmem:[%s1551_s5] sm:$0xff] %v987_v0 }
 0x205   :  { %v1273_v3 = vpop.eup %1272 }
 0x206   :  { %v988_v4 = vcombine.low %v1271_v2, %v1273_v3 }
 0x208   :  { %v995_v6 = vrot.slane %v988_v4, %v1398_v34 }
 0x20a   :  { %v1003_v7 = vcombine.low %v995_v6, %v1002_v5 }
 0x20c   :  { %1012 = vst.msk [vmem:[%s1551_s5 + $0x8] sm:$0x3f] %vm1011_vm7, %v1003_v7 }

</bundles_post_ra>
